<compile_context>
chip_gen: v6e
topology: v6e:2x2x1
jax: 0.10.0
libtpu: 0.0.40
codegen_flags: <defaults>
</compile_context>

<pallas_src>
import functools
import math

import jax
import jax.numpy as jnp
from jax import lax
from jax.experimental import pallas as pl
from jax.experimental.pallas import tpu as pltpu

_LANE = 128
_VMEM_LIMIT = 32 * 1024 * 1024   # <= scoped/physical VMEM on v5e/v6e/v7x


def _conv_acc(x_ref, w_ref, Lout, Coutp, K, compute_dtype):
    """Valid Conv1d tile (bias-free) as K shifted contractions, f32 accumulate."""
    Cin = x_ref.shape[2]
    acc = jnp.zeros((Lout, Coutp), jnp.float32)
    if Cin == 1:
        # Degenerate contraction (first FCN layer): VPU broadcast-FMA beats a
        # (Lout, 1) x (1, Cout) MXU matmul.
        w_f32 = w_ref[...].astype(jnp.float32)                 # (K, 1, Coutp)
        for k in range(K):                                     # K small & static
            acc = acc + x_ref[0, k:k + Lout, :] * w_f32[k]     # (Lout,1)*(1,Coutp)
    else:
        for k in range(K):
            xk = x_ref[0, k:k + Lout, :].astype(compute_dtype)  # (Lout, Cin)
            acc = acc + jnp.dot(xk, w_ref[k],
                                preferred_element_type=jnp.float32)
    return acc


def _stats_kernel(x_ref, w_ref, g_ref, beta_ref, s_ref, t_ref,
                  sum_ref, sq_ref, *, K, eps, inv_rows, compute_dtype):
    """Pass 1: per-channel sum / sum-of-squares of the (bias-free) conv over
    all rows; fused BN scale/shift emitted on the last grid step.  The conv
    bias cancels exactly under training-mode BN, so it never appears here."""
    n = pl.program_id(0)
    Lout = x_ref.shape[1] - K + 1
    Coutp = s_ref.shape[1]

    @pl.when(n == 0)
    def _init():
        sum_ref[...] = jnp.zeros_like(sum_ref)
        sq_ref[...] = jnp.zeros_like(sq_ref)

    acc = _conv_acc(x_ref, w_ref, Lout, Coutp, K, compute_dtype)
    sum_ref[...] += jnp.sum(acc, axis=0, keepdims=True)
    sq_ref[...] += jnp.sum(acc * acc, axis=0, keepdims=True)

    @pl.when(n == pl.num_programs(0) - 1)
    def _finalize():
        mean = sum_ref[...] * inv_rows
        var = sq_ref[...] * inv_rows - mean * mean            # biased variance
        s = g_ref[...] * lax.rsqrt(var + eps)                 # once per channel (EUP)
        s_ref[...] = s
        t_ref[...] = beta_ref[...] - mean * s


def _conv_bn_relu_kernel(x_ref, w_ref, s_ref, t_ref, o_ref, *, K, compute_dtype):
    """Pass 2: recompute conv on the MXU, y = relu(conv*s + t)."""
    Lout, Coutp = o_ref.shape[1], o_ref.shape[2]
    acc = _conv_acc(x_ref, w_ref, Lout, Coutp, K, compute_dtype)
    o_ref[0] = jnp.maximum(acc * s_ref[...] + t_ref[...],
                           0.0).astype(o_ref.dtype)


def _conv_bn_relu_mean_kernel(x_ref, w_ref, s_ref, t_ref, o_ref, *, K,
                              compute_dtype):
    """Pass 2 (last block): same as above plus fused global average pooling."""
    Lout = x_ref.shape[1] - K + 1
    Coutp = o_ref.shape[2]
    acc = _conv_acc(x_ref, w_ref, Lout, Coutp, K, compute_dtype)
    y = jnp.maximum(acc * s_ref[...] + t_ref[...], 0.0)
    o_ref[0] = jnp.mean(y, axis=0, keepdims=True)             # (1, Coutp)


def block_fcn_conv_nlc(x_nlc, weight, bias, gamma, beta, *, eps=1e-3,
                       compute_dtype=jnp.bfloat16, reduce_mean=False):
    """Conv1d(valid) -> BatchNorm1d(training stats) -> ReLU, channels-last.

    x_nlc: (N, L, C_in) f32, weight: (C_out, C_in, K), bias/gamma/beta: (C_out,).
    Returns (N, L_out, C_out), or (N, 1, C_out) (mean over L_out) if reduce_mean.
    """
    del bias  # conv bias cancels exactly under training-mode BatchNorm
    N, L, Cin = x_nlc.shape
    Cout, _, K = weight.shape
    Lout = L - K + 1
    Coutp = ((Cout + _LANE - 1) // _LANE) * _LANE
    pad = Coutp - Cout

    w = jnp.transpose(weight, (2, 1, 0))                      # (K, Cin, Cout)
    if pad:
        w = jnp.pad(w, ((0, 0), (0, 0), (0, pad)))
        gamma = jnp.pad(gamma, (0, pad))
        beta = jnp.pad(beta, (0, pad))
    w = w.astype(compute_dtype)
    g2 = gamma.reshape(1, Coutp).astype(jnp.float32)
    be2 = beta.reshape(1, Coutp).astype(jnp.float32)

    chan_spec = pl.BlockSpec((1, Coutp), lambda n: (0, 0))
    x_spec = pl.BlockSpec((1, L, Cin), lambda n: (n, 0, 0))
    w_spec = pl.BlockSpec((K, Cin, Coutp), lambda n: (0, 0, 0))

    # ---- pass 1: BN statistics (sequential reduction over batch rows) ----
    s, t = pl.pallas_call(
        functools.partial(_stats_kernel, K=K, eps=float(eps),
                          inv_rows=1.0 / float(N * Lout),
                          compute_dtype=compute_dtype),
        out_shape=(jax.ShapeDtypeStruct((1, Coutp), jnp.float32),
                   jax.ShapeDtypeStruct((1, Coutp), jnp.float32)),
        grid_spec=pltpu.PrefetchScalarGridSpec(
            num_scalar_prefetch=0,
            grid=(N,),
            in_specs=[x_spec, w_spec, chan_spec, chan_spec],
            out_specs=[chan_spec, chan_spec],
            scratch_shapes=[pltpu.VMEM((1, Coutp), jnp.float32),
                            pltpu.VMEM((1, Coutp), jnp.float32)]),
        compiler_params=pltpu.CompilerParams(
            dimension_semantics=("arbitrary",),
            vmem_limit_bytes=_VMEM_LIMIT),
    )(x_nlc, w, g2, be2)

    # ---- pass 2: recompute conv, normalize + affine + relu (+ optional mean) ----
    if reduce_mean:
        out_shape = jax.ShapeDtypeStruct((N, 1, Coutp), jnp.float32)
        out_spec = pl.BlockSpec((1, 1, Coutp), lambda n: (n, 0, 0))
        kern = functools.partial(_conv_bn_relu_mean_kernel, K=K,
                                 compute_dtype=compute_dtype)
    else:
        out_shape = jax.ShapeDtypeStruct((N, Lout, Coutp), jnp.float32)
        out_spec = pl.BlockSpec((1, Lout, Coutp), lambda n: (n, 0, 0))
        kern = functools.partial(_conv_bn_relu_kernel, K=K,
                                 compute_dtype=compute_dtype)

    out = pl.pallas_call(
        kern,
        out_shape=out_shape,
        grid_spec=pltpu.PrefetchScalarGridSpec(
            num_scalar_prefetch=0,
            grid=(N,),
            in_specs=[x_spec, w_spec, chan_spec, chan_spec],
            out_specs=out_spec),
        compiler_params=pltpu.CompilerParams(
            dimension_semantics=("parallel",),
            vmem_limit_bytes=_VMEM_LIMIT),
    )(x_nlc, w, s, t)

    if pad:
        out = out[:, :, :Cout]
    return out


def block_fcn_conv(x, weight, bias, gamma, beta, *, eps=1e-3,
                   compute_dtype=jnp.bfloat16, channels_last=True):
    """PyTorch-layout entry point. x: (N, C_in, L).  Returns (N, L_out, C_out)
    if channels_last else (N, C_out, L_out)."""
    x_nlc = jnp.transpose(x, (0, 2, 1)).astype(jnp.float32)
    out = block_fcn_conv_nlc(x_nlc, weight, bias, gamma, beta, eps=eps,
                             compute_dtype=compute_dtype)
    if not channels_last:
        out = jnp.transpose(out, (0, 2, 1))                   # PyTorch NCL
    return out


def block_fcn(x, params, *, eps=1e-3, compute_dtype=jnp.bfloat16):
    """BlockFCN: 3x BlockFCNConv + global average pooling (fused into block 3).

    x: (N, C0, L) PyTorch NCL.  params: list of (weight, bias, gamma, beta).
    Returns (N, C_last) — PyTorch's (N, C, 1) pooled output, squeezed."""
    h = jnp.transpose(x, (0, 2, 1)).astype(jnp.float32)       # channels-last chain
    n_layers = len(params)
    for i, (w, b, g, be) in enumerate(params):
        h = block_fcn_conv_nlc(h, w, b, g, be, eps=eps,
                               compute_dtype=compute_dtype,
                               reduce_mean=(i == n_layers - 1))
    return h[:, 0, :]


# ------------------------------ pure-JAX references ------------------------------

def _block_ref(x, weight, bias, gamma, beta, eps=1e-3):
    conv = lax.conv_general_dilated(
        x, weight, window_strides=(1,), padding="VALID",
        dimension_numbers=("NCH", "OIH", "NCH"))
    conv = conv + bias[None, :, None]
    mean = jnp.mean(conv, axis=(0, 2), keepdims=True)
    var = jnp.mean((conv - mean) ** 2, axis=(0, 2), keepdims=True)
    y = (conv - mean) * lax.rsqrt(var + eps)
    y = y * gamma[None, :, None] + beta[None, :, None]
    return jnp.maximum(y, 0.0)


def _block_fcn_ref(x, params, eps=1e-3):
    h = x
    for (w, b, g, be) in params:
        h = _block_ref(h, w, b, g, be, eps=eps)
    return jnp.mean(h, axis=-1)                               # AvgPool1d(full) + squeeze


def _make_inputs(key, N, Cin, L, Cout, K):
    kx, kw, kb, kg, kbe = jax.random.split(key, 5)
    x = jax.random.normal(kx, (N, Cin, L), dtype=jnp.float32)
    bound = math.sqrt(1.0 / (Cin * K))                        # PyTorch-like init scale
    weight = jax.random.uniform(kw, (Cout, Cin, K), minval=-bound,
                                maxval=bound, dtype=jnp.float32)
    bias = jax.random.uniform(kb, (Cout,), minval=-bound, maxval=bound,
                              dtype=jnp.float32)
    gamma = 1.0 + 0.1 * jax.random.normal(kg, (Cout,), dtype=jnp.float32)
    beta = 0.1 * jax.random.normal(kbe, (Cout,), dtype=jnp.float32)
    return x, weight, bias, gamma, beta


if __name__ == "__main__":
    eps = 1e-3
    k1, k2, k3 = jax.random.split(jax.random.PRNGKey(0), 3)

    # ---- Config A: single BlockFCNConv, padded-channel path (32 -> 128 lanes) ----
    N, Cin, L, Cout, K = 2, 4, 16, 32, 8
    x, w, b, g, be = _make_inputs(k1, N, Cin, L, Cout, K)
    ref_nlc = jnp.transpose(_block_ref(x, w, b, g, be, eps=eps), (0, 2, 1))

    y32 = jax.block_until_ready(
        block_fcn_conv(x, w, b, g, be, eps=eps, compute_dtype=jnp.float32))
    assert y32.shape == (N, L - K + 1, Cout)
    assert jnp.allclose(y32, ref_nlc, rtol=1e-3, atol=1e-3)

    ybf = jax.block_until_ready(
        block_fcn_conv(x, w, b, g, be, eps=eps, compute_dtype=jnp.bfloat16))
    assert jnp.allclose(ybf, ref_nlc, rtol=5e-2, atol=5e-2)
    ref_q = _block_ref(x.astype(jnp.bfloat16).astype(jnp.float32),
                       w.astype(jnp.bfloat16).astype(jnp.float32),
                       b, g, be, eps=eps)
    assert jnp.allclose(ybf, jnp.transpose(ref_q, (0, 2, 1)),
                        rtol=2e-3, atol=2e-3)

    # ---- Config B: lane-dense C_out (128, no padding), PyTorch NCL output ----
    N, Cin, L, Cout, K = 4, 4, 24, 128, 5
    x, w, b, g, be = _make_inputs(k2, N, Cin, L, Cout, K)
    ref = _block_ref(x, w, b, g, be, eps=eps)
    y = jax.block_until_ready(
        block_fcn_conv(x, w, b, g, be, eps=eps, compute_dtype=jnp.float32,
                       channels_last=False))
    assert y.shape == (N, Cout, L - K + 1)
    assert jnp.allclose(y, ref, rtol=1e-3, atol=1e-3)

    # ---- Config C: full FCN branch (3 blocks + fused global average pooling) ----
    # Mirrors BlockFCN(time_steps=340, channels=[1,128,256,256], kernels=[8,5,3])
    # at small shapes: time_steps=24, channels=[1,32,32,32].
    N, T = 2, 24
    channels, kernels = [1, 32, 32, 32], [8, 5, 3]
    kx, kp0, kp1, kp2 = jax.random.split(k3, 4)
    x = jax.random.normal(kx, (N, channels[0], T), dtype=jnp.float32)
    params = []
    for i, kp in enumerate((kp0, kp1, kp2)):
        _, w_i, b_i, g_i, be_i = _make_inputs(kp, 1, channels[i], 8,
                                              channels[i + 1], kernels[i])
        params.append((w_i, b_i, g_i, be_i))

    ref_fcn = _block_fcn_ref(x, params, eps=eps)
    y_fcn = jax.block_until_ready(
        block_fcn(x, params, eps=eps, compute_dtype=jnp.float32))
    assert y_fcn.shape == (N, channels[-1])
    assert jnp.allclose(y_fcn, ref_fcn, rtol=1e-3, atol=1e-3)

    print("KERNEL_OK")
</pallas_src>

<mosaic_0001>
module attributes {stable_mosaic.version = 11 : i64} {
  func.func @_stats_kernel(%arg0: i32, %arg1: memref<1x16x4xf32, #tpu.memory_space<vmem>>, %arg2: memref<8x4x128xf32, #tpu.memory_space<vmem>>, %arg3: memref<1x128xf32, #tpu.memory_space<vmem>>, %arg4: memref<1x128xf32, #tpu.memory_space<vmem>>, %arg5: memref<1x128xf32, #tpu.memory_space<vmem>>, %arg6: memref<1x128xf32, #tpu.memory_space<vmem>>, %arg7: memref<1x128xf32, #tpu.memory_space<vmem>>, %arg8: memref<1x128xf32, #tpu.memory_space<vmem>>) attributes {dimension_semantics = [#tpu.dimension_semantics<arbitrary>], iteration_bounds = array<i64: 2>, scalar_prefetch = 0 : i64, scratch_operands = 2 : i64, tpu.core_type = #tpu.core_type<tc>, window_params = [{transform_indices = @transform_0, window_bounds = array<i64: 1, 16, 4>}, {pipeline_mode = #tpu.pipeline_mode<synchronous>, transform_indices = @transform_1, window_bounds = array<i64: 8, 4, 128>}, {pipeline_mode = #tpu.pipeline_mode<synchronous>, transform_indices = @transform_2, window_bounds = array<i64: 1, 128>}, {pipeline_mode = #tpu.pipeline_mode<synchronous>, transform_indices = @transform_3, window_bounds = array<i64: 1, 128>}, {pipeline_mode = #tpu.pipeline_mode<synchronous>, transform_indices = @transform_4, window_bounds = array<i64: 1, 128>}, {pipeline_mode = #tpu.pipeline_mode<synchronous>, transform_indices = @transform_5, window_bounds = array<i64: 1, 128>}]} {
    %c0_i32 = arith.constant 0 : i32
    %0 = arith.cmpi eq, %arg0, %c0_i32 : i32
    %1 = arith.extui %0 : i1 to i32
    %c0_i32_0 = arith.constant 0 : i32
    %2 = arith.cmpi ne, %1, %c0_i32_0 : i32
    scf.if %2 {
      %cst_60 = arith.constant 0.000000e+00 : f32
      %66 = vector.broadcast %cst_60 : f32 to vector<1x128xf32>
      %c0_61 = arith.constant 0 : index
      %c0_62 = arith.constant 0 : index
      %67 = vector.load %arg7[%c0_61, %c0_62] : memref<1x128xf32, #tpu.memory_space<vmem>>, vector<1x128xf32>
      tpu.vector_store %arg7[%c0_61, %c0_62], %66 {strides = array<i32>} : memref<1x128xf32, #tpu.memory_space<vmem>>, vector<1x128xf32>,
      %cst_63 = arith.constant 0.000000e+00 : f32
      %68 = vector.broadcast %cst_63 : f32 to vector<1x128xf32>
      %c0_64 = arith.constant 0 : index
      %c0_65 = arith.constant 0 : index
      %69 = vector.load %arg8[%c0_64, %c0_65] : memref<1x128xf32, #tpu.memory_space<vmem>>, vector<1x128xf32>
      tpu.vector_store %arg8[%c0_64, %c0_65], %68 {strides = array<i32>} : memref<1x128xf32, #tpu.memory_space<vmem>>, vector<1x128xf32>,
    } else {
    }
    %cst = arith.constant 0.000000e+00 : f32
    %3 = vector.broadcast %cst : f32 to vector<9x128xf32>
    %c0 = arith.constant 0 : index
    %c0_1 = arith.constant 0 : index
    %c0_2 = arith.constant 0 : index
    %4 = vector.load %arg1[%c0, %c0_1, %c0_2] : memref<1x16x4xf32, #tpu.memory_space<vmem>>, vector<1x9x4xf32>
    %5 = vector.shape_cast %4 : vector<1x9x4xf32> to vector<9x4xf32>
    %c0_3 = arith.constant 0 : index
    %c0_4 = arith.constant 0 : index
    %c0_5 = arith.constant 0 : index
    %6 = vector.load %arg2[%c0_3, %c0_4, %c0_5] : memref<8x4x128xf32, #tpu.memory_space<vmem>>, vector<1x4x128xf32>
    %7 = vector.shape_cast %6 : vector<1x4x128xf32> to vector<4x128xf32>
    %cst_6 = arith.constant dense<0.000000e+00> : vector<9x128xf32>
    %8 = tpu.matmul %5, %7, %cst_6 {dimension_numbers = #tpu.dot_dimension_numbers<[1], [0], [0], [1], [0, 0, 1, 1], [], []>} : vector<9x4xf32>, vector<4x128xf32>, vector<9x128xf32> -> vector<9x128xf32>
    %9 = arith.addf %3, %8 : vector<9x128xf32>
    %c0_7 = arith.constant 0 : index
    %c1 = arith.constant 1 : index
    %c0_8 = arith.constant 0 : index
    %10 = vector.load %arg1[%c0_7, %c1, %c0_8] : memref<1x16x4xf32, #tpu.memory_space<vmem>>, vector<1x9x4xf32>
    %11 = vector.shape_cast %10 : vector<1x9x4xf32> to vector<9x4xf32>
    %c1_9 = arith.constant 1 : index
    %c0_10 = arith.constant 0 : index
    %c0_11 = arith.constant 0 : index
    %12 = vector.load %arg2[%c1_9, %c0_10, %c0_11] : memref<8x4x128xf32, #tpu.memory_space<vmem>>, vector<1x4x128xf32>
    %13 = vector.shape_cast %12 : vector<1x4x128xf32> to vector<4x128xf32>
    %cst_12 = arith.constant dense<0.000000e+00> : vector<9x128xf32>
    %14 = tpu.matmul %11, %13, %cst_12 {dimension_numbers = #tpu.dot_dimension_numbers<[1], [0], [0], [1], [0, 0, 1, 1], [], []>} : vector<9x4xf32>, vector<4x128xf32>, vector<9x128xf32> -> vector<9x128xf32>
    %15 = arith.addf %9, %14 : vector<9x128xf32>
    %c0_13 = arith.constant 0 : index
    %c2 = arith.constant 2 : index
    %c0_14 = arith.constant 0 : index
    %16 = vector.load %arg1[%c0_13, %c2, %c0_14] : memref<1x16x4xf32, #tpu.memory_space<vmem>>, vector<1x9x4xf32>
    %17 = vector.shape_cast %16 : vector<1x9x4xf32> to vector<9x4xf32>
    %c2_15 = arith.constant 2 : index
    %c0_16 = arith.constant 0 : index
    %c0_17 = arith.constant 0 : index
    %18 = vector.load %arg2[%c2_15, %c0_16, %c0_17] : memref<8x4x128xf32, #tpu.memory_space<vmem>>, vector<1x4x128xf32>
    %19 = vector.shape_cast %18 : vector<1x4x128xf32> to vector<4x128xf32>
    %cst_18 = arith.constant dense<0.000000e+00> : vector<9x128xf32>
    %20 = tpu.matmul %17, %19, %cst_18 {dimension_numbers = #tpu.dot_dimension_numbers<[1], [0], [0], [1], [0, 0, 1, 1], [], []>} : vector<9x4xf32>, vector<4x128xf32>, vector<9x128xf32> -> vector<9x128xf32>
    %21 = arith.addf %15, %20 : vector<9x128xf32>
    %c0_19 = arith.constant 0 : index
    %c3 = arith.constant 3 : index
    %c0_20 = arith.constant 0 : index
    %22 = vector.load %arg1[%c0_19, %c3, %c0_20] : memref<1x16x4xf32, #tpu.memory_space<vmem>>, vector<1x9x4xf32>
    %23 = vector.shape_cast %22 : vector<1x9x4xf32> to vector<9x4xf32>
    %c3_21 = arith.constant 3 : index
    %c0_22 = arith.constant 0 : index
    %c0_23 = arith.constant 0 : index
    %24 = vector.load %arg2[%c3_21, %c0_22, %c0_23] : memref<8x4x128xf32, #tpu.memory_space<vmem>>, vector<1x4x128xf32>
    %25 = vector.shape_cast %24 : vector<1x4x128xf32> to vector<4x128xf32>
    %cst_24 = arith.constant dense<0.000000e+00> : vector<9x128xf32>
    %26 = tpu.matmul %23, %25, %cst_24 {dimension_numbers = #tpu.dot_dimension_numbers<[1], [0], [0], [1], [0, 0, 1, 1], [], []>} : vector<9x4xf32>, vector<4x128xf32>, vector<9x128xf32> -> vector<9x128xf32>
    %27 = arith.addf %21, %26 : vector<9x128xf32>
    %c0_25 = arith.constant 0 : index
    %c4 = arith.constant 4 : index
    %c0_26 = arith.constant 0 : index
    %28 = vector.load %arg1[%c0_25, %c4, %c0_26] : memref<1x16x4xf32, #tpu.memory_space<vmem>>, vector<1x9x4xf32>
    %29 = vector.shape_cast %28 : vector<1x9x4xf32> to vector<9x4xf32>
    %c4_27 = arith.constant 4 : index
    %c0_28 = arith.constant 0 : index
    %c0_29 = arith.constant 0 : index
    %30 = vector.load %arg2[%c4_27, %c0_28, %c0_29] : memref<8x4x128xf32, #tpu.memory_space<vmem>>, vector<1x4x128xf32>
    %31 = vector.shape_cast %30 : vector<1x4x128xf32> to vector<4x128xf32>
    %cst_30 = arith.constant dense<0.000000e+00> : vector<9x128xf32>
    %32 = tpu.matmul %29, %31, %cst_30 {dimension_numbers = #tpu.dot_dimension_numbers<[1], [0], [0], [1], [0, 0, 1, 1], [], []>} : vector<9x4xf32>, vector<4x128xf32>, vector<9x128xf32> -> vector<9x128xf32>
    %33 = arith.addf %27, %32 : vector<9x128xf32>
    %c0_31 = arith.constant 0 : index
    %c5 = arith.constant 5 : index
    %c0_32 = arith.constant 0 : index
    %34 = vector.load %arg1[%c0_31, %c5, %c0_32] : memref<1x16x4xf32, #tpu.memory_space<vmem>>, vector<1x9x4xf32>
    %35 = vector.shape_cast %34 : vector<1x9x4xf32> to vector<9x4xf32>
    %c5_33 = arith.constant 5 : index
    %c0_34 = arith.constant 0 : index
    %c0_35 = arith.constant 0 : index
    %36 = vector.load %arg2[%c5_33, %c0_34, %c0_35] : memref<8x4x128xf32, #tpu.memory_space<vmem>>, vector<1x4x128xf32>
    %37 = vector.shape_cast %36 : vector<1x4x128xf32> to vector<4x128xf32>
    %cst_36 = arith.constant dense<0.000000e+00> : vector<9x128xf32>
    %38 = tpu.matmul %35, %37, %cst_36 {dimension_numbers = #tpu.dot_dimension_numbers<[1], [0], [0], [1], [0, 0, 1, 1], [], []>} : vector<9x4xf32>, vector<4x128xf32>, vector<9x128xf32> -> vector<9x128xf32>
    %39 = arith.addf %33, %38 : vector<9x128xf32>
    %c0_37 = arith.constant 0 : index
    %c6 = arith.constant 6 : index
    %c0_38 = arith.constant 0 : index
    %40 = vector.load %arg1[%c0_37, %c6, %c0_38] : memref<1x16x4xf32, #tpu.memory_space<vmem>>, vector<1x9x4xf32>
    %41 = vector.shape_cast %40 : vector<1x9x4xf32> to vector<9x4xf32>
    %c6_39 = arith.constant 6 : index
    %c0_40 = arith.constant 0 : index
    %c0_41 = arith.constant 0 : index
    %42 = vector.load %arg2[%c6_39, %c0_40, %c0_41] : memref<8x4x128xf32, #tpu.memory_space<vmem>>, vector<1x4x128xf32>
    %43 = vector.shape_cast %42 : vector<1x4x128xf32> to vector<4x128xf32>
    %cst_42 = arith.constant dense<0.000000e+00> : vector<9x128xf32>
    %44 = tpu.matmul %41, %43, %cst_42 {dimension_numbers = #tpu.dot_dimension_numbers<[1], [0], [0], [1], [0, 0, 1, 1], [], []>} : vector<9x4xf32>, vector<4x128xf32>, vector<9x128xf32> -> vector<9x128xf32>
    %45 = arith.addf %39, %44 : vector<9x128xf32>
    %c0_43 = arith.constant 0 : index
    %c7 = arith.constant 7 : index
    %c0_44 = arith.constant 0 : index
    %46 = vector.load %arg1[%c0_43, %c7, %c0_44] : memref<1x16x4xf32, #tpu.memory_space<vmem>>, vector<1x9x4xf32>
    %47 = vector.shape_cast %46 : vector<1x9x4xf32> to vector<9x4xf32>
    %c7_45 = arith.constant 7 : index
    %c0_46 = arith.constant 0 : index
    %c0_47 = arith.constant 0 : index
    %48 = vector.load %arg2[%c7_45, %c0_46, %c0_47] : memref<8x4x128xf32, #tpu.memory_space<vmem>>, vector<1x4x128xf32>
    %49 = vector.shape_cast %48 : vector<1x4x128xf32> to vector<4x128xf32>
    %cst_48 = arith.constant dense<0.000000e+00> : vector<9x128xf32>
    %50 = tpu.matmul %47, %49, %cst_48 {dimension_numbers = #tpu.dot_dimension_numbers<[1], [0], [0], [1], [0, 0, 1, 1], [], []>} : vector<9x4xf32>, vector<4x128xf32>, vector<9x128xf32> -> vector<9x128xf32>
    %51 = arith.addf %45, %50 : vector<9x128xf32>
    %c0_49 = arith.constant 0 : index
    %c0_50 = arith.constant 0 : index
    %52 = vector.load %arg7[%c0_49, %c0_50] : memref<1x128xf32, #tpu.memory_space<vmem>>, vector<1x128xf32>
    %cst_51 = arith.constant dense<0.000000e+00> : vector<128xf32>
    %53 = vector.multi_reduction <add>, %51, %cst_51 [0] : vector<9x128xf32> to vector<128xf32>
    %54 = vector.shape_cast %53 : vector<128xf32> to vector<1x128xf32>
    %55 = arith.addf %52, %54 : vector<1x128xf32>
    %c0_52 = arith.constant 0 : index
    %c0_53 = arith.constant 0 : index
    %56 = vector.load %arg7[%c0_52, %c0_53] : memref<1x128xf32, #tpu.memory_space<vmem>>, vector<1x128xf32>
    tpu.vector_store %arg7[%c0_52, %c0_53], %55 {strides = array<i32>} : memref<1x128xf32, #tpu.memory_space<vmem>>, vector<1x128xf32>,
    %c0_54 = arith.constant 0 : index
    %c0_55 = arith.constant 0 : index
    %57 = vector.load %arg8[%c0_54, %c0_55] : memref<1x128xf32, #tpu.memory_space<vmem>>, vector<1x128xf32>
    %58 = arith.mulf %51, %51 : vector<9x128xf32>
    %cst_56 = arith.constant dense<0.000000e+00> : vector<128xf32>
    %59 = vector.multi_reduction <add>, %58, %cst_56 [0] : vector<9x128xf32> to vector<128xf32>
    %60 = vector.shape_cast %59 : vector<128xf32> to vector<1x128xf32>
    %61 = arith.addf %57, %60 : vector<1x128xf32>
    %c0_57 = arith.constant 0 : index
    %c0_58 = arith.constant 0 : index
    %62 = vector.load %arg8[%c0_57, %c0_58] : memref<1x128xf32, #tpu.memory_space<vmem>>, vector<1x128xf32>
    tpu.vector_store %arg8[%c0_57, %c0_58], %61 {strides = array<i32>} : memref<1x128xf32, #tpu.memory_space<vmem>>, vector<1x128xf32>,
    %c1_i32 = arith.constant 1 : i32
    %63 = arith.cmpi eq, %arg0, %c1_i32 : i32
    %64 = arith.extui %63 : i1 to i32
    %c0_i32_59 = arith.constant 0 : i32
    %65 = arith.cmpi ne, %64, %c0_i32_59 : i32
    scf.if %65 {
      %c0_60 = arith.constant 0 : index
      %c0_61 = arith.constant 0 : index
      %66 = vector.load %arg7[%c0_60, %c0_61] : memref<1x128xf32, #tpu.memory_space<vmem>>, vector<1x128xf32>
      %cst_62 = arith.constant 0.055555556 : f32
      %67 = vector.broadcast %cst_62 : f32 to vector<1x128xf32>
      %68 = arith.mulf %66, %67 : vector<1x128xf32>
      %c0_63 = arith.constant 0 : index
      %c0_64 = arith.constant 0 : index
      %69 = vector.load %arg8[%c0_63, %c0_64] : memref<1x128xf32, #tpu.memory_space<vmem>>, vector<1x128xf32>
      %cst_65 = arith.constant 0.055555556 : f32
      %70 = vector.broadcast %cst_65 : f32 to vector<1x128xf32>
      %71 = arith.mulf %69, %70 : vector<1x128xf32>
      %72 = arith.mulf %68, %68 : vector<1x128xf32>
      %73 = arith.subf %71, %72 : vector<1x128xf32>
      %c0_66 = arith.constant 0 : index
      %c0_67 = arith.constant 0 : index
      %74 = vector.load %arg3[%c0_66, %c0_67] : memref<1x128xf32, #tpu.memory_space<vmem>>, vector<1x128xf32>
      %cst_68 = arith.constant 1.000000e-03 : f32
      %75 = vector.broadcast %cst_68 : f32 to vector<1x128xf32>
      %76 = arith.addf %73, %75 : vector<1x128xf32>
      %77 = math.rsqrt %76 : vector<1x128xf32>
      %78 = arith.mulf %74, %77 : vector<1x128xf32>
      %c0_69 = arith.constant 0 : index
      %c0_70 = arith.constant 0 : index
      %79 = vector.load %arg5[%c0_69, %c0_70] : memref<1x128xf32, #tpu.memory_space<vmem>>, vector<1x128xf32>
      tpu.vector_store %arg5[%c0_69, %c0_70], %78 {strides = array<i32>} : memref<1x128xf32, #tpu.memory_space<vmem>>, vector<1x128xf32>,
      %c0_71 = arith.constant 0 : index
      %c0_72 = arith.constant 0 : index
      %80 = vector.load %arg4[%c0_71, %c0_72] : memref<1x128xf32, #tpu.memory_space<vmem>>, vector<1x128xf32>
      %81 = arith.mulf %68, %78 : vector<1x128xf32>
      %82 = arith.subf %80, %81 : vector<1x128xf32>
      %c0_73 = arith.constant 0 : index
      %c0_74 = arith.constant 0 : index
      %83 = vector.load %arg6[%c0_73, %c0_74] : memref<1x128xf32, #tpu.memory_space<vmem>>, vector<1x128xf32>
      tpu.vector_store %arg6[%c0_73, %c0_74], %82 {strides = array<i32>} : memref<1x128xf32, #tpu.memory_space<vmem>>, vector<1x128xf32>,
    } else {
    }
    return
  }
  func.func @transform_0(%arg0: i32) -> (i32, i32, i32) {
    %c0_i32 = arith.constant 0 : i32
    %c0_i32_0 = arith.constant 0 : i32
    %c0_i32_1 = arith.constant 0 : i32
    return %arg0, %c0_i32, %c0_i32_0 : i32, i32, i32
  }
  func.func @transform_1(%arg0: i32) -> (i32, i32, i32) {
    %c0_i32 = arith.constant 0 : i32
    %c0_i32_0 = arith.constant 0 : i32
    %c0_i32_1 = arith.constant 0 : i32
    %c0_i32_2 = arith.constant 0 : i32
    return %c0_i32, %c0_i32_0, %c0_i32_1 : i32, i32, i32
  }
  func.func @transform_2(%arg0: i32) -> (i32, i32) {
    %c0_i32 = arith.constant 0 : i32
    %c0_i32_0 = arith.constant 0 : i32
    %c0_i32_1 = arith.constant 0 : i32
    return %c0_i32, %c0_i32_0 : i32, i32
  }
  func.func @transform_3(%arg0: i32) -> (i32, i32) {
    %c0_i32 = arith.constant 0 : i32
    %c0_i32_0 = arith.constant 0 : i32
    %c0_i32_1 = arith.constant 0 : i32
    return %c0_i32, %c0_i32_0 : i32, i32
  }
  func.func @transform_4(%arg0: i32) -> (i32, i32) {
    %c0_i32 = arith.constant 0 : i32
    %c0_i32_0 = arith.constant 0 : i32
    %c0_i32_1 = arith.constant 0 : i32
    return %c0_i32, %c0_i32_0 : i32, i32
  }
  func.func @transform_5(%arg0: i32) -> (i32, i32) {
    %c0_i32 = arith.constant 0 : i32
    %c0_i32_0 = arith.constant 0 : i32
    %c0_i32_1 = arith.constant 0 : i32
    return %c0_i32, %c0_i32_0 : i32, i32
  }
}

</mosaic_0001>

<bundles_post_ra>
// kernel: tpu_custom_call.1
= control target key start
LH: loop header
LB: loop body
LE: loop exit
PB: predicated region body
PF: predicated region fallthrough
CT: control target
= control target key end

     0   :  { %11 = vsyncpa [#allocation5], 0  ;;  %s1400_s0 = inlined_call_operand.vmem [shape: f32[2,16,4], index: 0, kind: input, shape index: {}]   ;;  %s1401_s1 = inlined_call_operand.vmem [shape: f32[8,4,128], index: 1, kind: input, shape index: {}]   ;;  %s1402_s2 = inlined_call_operand.vmem [shape: f32[1,128], index: 2, kind: input, shape index: {}]   ;;  %s1403_s3 = inlined_call_operand.vmem [shape: f32[1,128], index: 3, kind: input, shape index: {}]   ;;  %s1404_s4 = inlined_call_operand.hbm [shape: f32[1,128], index: 4, kind: output, shape index: {0}]   ;;  %s1405_s5 = inlined_call_operand.hbm [shape: f32[1,128], index: 5, kind: output, shape index: {1}]  }
   0x1   :  { %12 = vsyncpa [#allocation7], 0  ;;  %s1277_s18 = smov 0  }
   0x2 LB: > { %s1283_s19 = sadd.s32 4294967295, %s1242_s18   ;;  %p1048_p0 = scmp.ge.s32.totalorder %s1242_s18, 1  ;;  %s1242_s18 = sphi %s1277_s18, %s18_s18  }
   0x3   : > { %p182_p1 = scmp.lt.s32.totalorder %s1242_s18, 3 }
   0x5   : > { %p183_p2 = pnand %p1048_p0, %p182_p1 }
   0x6   : > { %p205_p3 = scmp.lt.s32.totalorder (!%p183_p2), %s1283_s19, 1  ;;  %p1051_p4 = scmp.ne.s32.totalorder (!%p183_p2), %s1283_s19, 0 }
   0x7   : > { %186 = sbr.rel (%p183_p2) target bundleno = 316 (0x13c), region = 36 }
   0xc   : > { %s206_s20 = scalar_select %p205_p3, %s1283_s19, 1 }
   0xd   : > { %213 = sbr.rel (%p1051_p4) target bundleno = 20 (0x14), region = 40 }
   0xe   : > { %s1090_s21 = sshll.u32 %s206_s20, 4 }
   0xf   : > { %s1292_s24 = scalar_lea.vmem %s1400_s0, %s1090_s21 }
  0x12   : > { %v1244_v0 = vmov 0.0  }
  0x13   : > { %214 = vst [vmem:[#allocation2] sm:$0x1] %v1244_v0  ;;  %215 = vst [vmem:[#allocation3] sm:$0x1] %v1244_v0 }
  0x14 PF: > { %v1052_v1 = vld [vmem:[%s1401_s1 + $0x4] sm:$0xf]  ;;  %vm230_vm0 = vcmask 1043456   ;;  %v218_v2 = vld [vmem:[%s1401_s1] sm:$0xf]  ;;  %vm223_vm1 = vcmask 31744  }
  0x15   : > { %v219_v3 = vld [vmem:[%s1292_s24 + $0x1] sm:$0xff]  ;;  %1115 = vmatprep.subr.msk.mxu0 %vm230_vm0, %v1052_v1  ;;  %1120 = vmatprep.subr.msk.mxu1 %vm230_vm0, %v218_v2  ;;  %v220_v5 = vld [vmem:[%s1292_s24 + $0x9] sm:$0x1]  ;;  %v1063_v8 = vld [vmem:[%s1401_s1 + $0xc] sm:$0xf]  ;;  %vm934_vm2 = vcmask 1040384  }
  0x16   : > { %v216_v4 = vld [vmem:[%s1292_s24] sm:$0xff]  ;;  %v217_v6 = vld [vmem:[%s1292_s24 + $0x8] sm:$0x1]  ;;  %1116 = vmatpush3.msk.msra.mxu0 %vm230_vm0, %v1052_v1  ;;  %1117 = vmatprep.mubr.msk.f32.mxu0 %vm223_vm1, %v219_v3  ;;  %v394_v11 = vld [vmem:[%s1292_s24 + $0xa] sm:$0x1]  ;;  %p1083_p5 = scmp.ne.s32.totalorder %s1283_s19, 1 }
  0x17   : > { %v1059_v7 = vld [vmem:[%s1401_s1 + $0x8] sm:$0xf]  ;;  %1121 = vmatpush3.msk.msra.mxu1 %vm230_vm0, %v218_v2  ;;  %1122 = vmatprep.mubr.msk.f32.mxu1 %vm223_vm1, %v216_v4  ;;  %v1067_v12 = vld [vmem:[%s1401_s1 + $0x10] sm:$0xf]  ;;  %v1071_v14 = vld [vmem:[%s1401_s1 + $0x14] sm:$0xf] }
  0x18   : > { %v393_v9 = vld [vmem:[%s1292_s24 + $0x2] sm:$0xff]  ;;  %1118 = vmatmul.mubr.msk.f32.vlgmr.msra.gmra.mxu0 %vm223_vm1, %v220_v5  ;;  %1123 = vmatmul.mubr.msk.f32.vlgmr.msra.gmra.mxu1 %vm223_vm1, %v217_v6  ;;  %v484_v13 = vld [vmem:[%s1292_s24 + $0xb] sm:$0x1]  ;;  %v574_v17 = vld [vmem:[%s1292_s24 + $0xc] sm:$0x1] }
  0x19   : > { %v483_v10 = vld [vmem:[%s1292_s24 + $0x3] sm:$0xff]  ;;  %1125 = vmatprep.subr.msk.mxu0 %vm230_vm0, %v1059_v7  ;;  %1130 = vmatprep.subr.msk.mxu1 %vm230_vm0, %v1063_v8  ;;  %v1075_v18 = vld [vmem:[%s1401_s1 + $0x18] sm:$0xf]  ;;  %v664_v19 = vld [vmem:[%s1292_s24 + $0xd] sm:$0x1] }
  0x1a   : > { %1126 = vmatpush3.msk.msra.mxu0 %vm230_vm0, %v1059_v7  ;;  %1127 = vmatprep.mubr.msk.f32.mxu0 %vm223_vm1, %v393_v9  ;;  %v573_v15 = vld [vmem:[%s1292_s24 + $0x4] sm:$0xff]  ;;  %v1079_v20 = vld [vmem:[%s1401_s1 + $0x1c] sm:$0xf]  ;;  %v754_v23 = vld [vmem:[%s1292_s24 + $0xe] sm:$0x1] }
  0x1b   : > { %1131 = vmatpush3.msk.msra.mxu1 %vm230_vm0, %v1063_v8  ;;  %1132 = vmatprep.mubr.msk.f32.mxu1 %vm223_vm1, %v483_v10  ;;  %v663_v16 = vld [vmem:[%s1292_s24 + $0x5] sm:$0xff]  ;;  %v844_v24 = vld [vmem:[%s1292_s24 + $0xf] sm:$0x1]  ;;  %v933_v6 = vld [vmem:[#allocation2] sm:$0x1] }
  0x1c   : > { %1128 = vmatmul.mubr.msk.f32.vlgmr.msra.gmra.mxu0 %vm223_vm1, %v394_v11  ;;  %1135 = vmatprep.subr.msk.mxu0 %vm230_vm0, %v1067_v12  ;;  %v753_v21 = vld [vmem:[%s1292_s24 + $0x6] sm:$0xff]  ;;  %v945_v9 = vld [vmem:[#allocation3] sm:$0x1] }
  0x1d   : > { %1133 = vmatmul.mubr.msk.f32.vlgmr.msra.gmra.mxu1 %vm223_vm1, %v484_v13  ;;  %1136 = vmatpush3.msk.msra.mxu0 %vm230_vm0, %v1067_v12  ;;  %v843_v22 = vld [vmem:[%s1292_s24 + $0x7] sm:$0xff] }
  0x1e   : > { %1140 = vmatprep.subr.msk.mxu1 %vm230_vm0, %v1071_v14  ;;  %1137 = vmatprep.mubr.msk.f32.mxu0 %vm223_vm1, %v573_v15 }
  0x1f   : > { %1141 = vmatpush3.msk.msra.mxu1 %vm230_vm0, %v1071_v14  ;;  %1142 = vmatprep.mubr.msk.f32.mxu1 %vm223_vm1, %v663_v16 }
  0x20   : > { %1138 = vmatmul.mubr.msk.f32.vlgmr.msra.gmra.mxu0 %vm223_vm1, %v574_v17  ;;  %1145 = vmatprep.subr.msk.mxu0 %vm230_vm0, %v1075_v18 }
  0x21   : > { %1143 = vmatmul.mubr.msk.f32.vlgmr.msra.gmra.mxu1 %vm223_vm1, %v664_v19  ;;  %1146 = vmatpush3.msk.msra.mxu0 %vm230_vm0, %v1075_v18 }
  0x22   : > { %1150 = vmatprep.subr.msk.mxu1 %vm230_vm0, %v1079_v20  ;;  %1147 = vmatprep.mubr.msk.f32.mxu0 %vm223_vm1, %v753_v21 }
  0x23   : > { %1151 = vmatpush3.msk.msra.mxu1 %vm230_vm0, %v1079_v20  ;;  %1152 = vmatprep.mubr.msk.f32.mxu1 %vm223_vm1, %v843_v22 }
  0x24   : > { %1148 = vmatmul.mubr.msk.f32.vlgmr.msra.gmra.mxu0 %vm223_vm1, %v754_v23 }
  0x25   : > { %1153 = vmatmul.mubr.msk.f32.vlgmr.msra.gmra.mxu1 %vm223_vm1, %v844_v24 }
  0xd8   : > { %v1119_v25 = vpop.f32.mrf.mxu0  ;;  %v1124_v26 = vpop.f32.mrf.mxu1 }
  0xd9   : > { %v390_v29 = vadd.f32 %v1124_v26, %v1119_v25 }
  0xda   : > { %v300_v27 = vpop.f32.mrf.mxu0  ;;  %v384_v28 = vpop.f32.mrf.mxu1 }
  0xdb   : > { %v385_v31 = vadd.f32 %v384_v28, %v300_v27 }
  0xdc   : > { %v1129_v30 = vpop.f32.mrf.mxu0 }
  0xdd   : > { %v482_v32 = vadd.f32 %v1129_v30, %v390_v29  ;;  %v1134_v33 = vpop.f32.mrf.mxu1 }
  0xde   : > { %v472_v34 = vpop.f32.mrf.mxu0 }
  0xdf   : > { %v572_v35 = vadd.f32 %v1134_v33, %v482_v32  ;;  %v481_v36 = vadd.f32 %v472_v34, %v385_v31  ;;  %v562_v37 = vpop.f32.mrf.mxu1 }
  0xe0   : > { %v1139_v38 = vpop.f32.mrf.mxu0 }
  0xe1   : > { %v571_v39 = vadd.f32 %v562_v37, %v481_v36  ;;  %v662_v40 = vadd.f32 %v1139_v38, %v572_v35  ;;  %v1144_v41 = vpop.f32.mrf.mxu1 }
  0xe2   : > { %v652_v42 = vpop.f32.mrf.mxu0 }
  0xe3   : > { %v752_v43 = vadd.f32 %v1144_v41, %v662_v40  ;;  %v661_v44 = vadd.f32 %v652_v42, %v571_v39  ;;  %v742_v45 = vpop.f32.mrf.mxu1 }
  0xe4   : > { %v1149_v46 = vpop.f32.mrf.mxu0 }
  0xe5   : > { %v751_v47 = vadd.f32 %v742_v45, %v661_v44  ;;  %v842_v48 = vadd.f32 %v1149_v46, %v752_v43  ;;  %v1154_v49 = vpop.f32.mrf.mxu1 }
  0xe6   : > { %v832_v50 = vpop.f32.mrf.mxu0 }
  0xe7   : > { %v932_v51 = vadd.f32 %v1154_v49, %v842_v48  ;;  %v841_v52 = vadd.f32 %v832_v50, %v751_v47  ;;  %v922_v53 = vpop.f32.mrf.mxu1 }
  0xe9   : > { %v935_v54 = vsel %vm934_vm2, %v932_v51, 0.0  ;;  %v947_v55 = vmul.f32 %v932_v51, %v932_v51  ;;  %v931_v56 = vadd.f32 %v922_v53, %v841_v52 }
  0xeb   : > { %v948_v57 = vsel %vm934_vm2, %v947_v55, 0.0  ;;  %v936_v58 = vadd.f32 %v935_v54, %v931_v56  ;;  %v946_v59 = vmul.f32 %v931_v56, %v931_v56 }
  0xed   : > { %v937_v60 = vrot.slane %v936_v58, 4  ;;  %v949_v61 = vadd.f32 %v948_v57, %v946_v59 }
  0xef   : > { %v938_v62 = vadd.f32 %v937_v60, %v936_v58  ;;  %v950_v63 = vrot.slane %v949_v61, 4 }
  0xf1   : > { %v939_v0 = vrot.slane %v938_v62, 2  ;;  %v951_v1 = vadd.f32 %v950_v63, %v949_v61 }
  0xf3   : > { %v940_v2 = vadd.f32 %v939_v0, %v938_v62  ;;  %v952_v3 = vrot.slane %v951_v1, 2 }
  0xf5   : > { %v941_v4 = vrot.slane %v940_v2, 1  ;;  %v953_v5 = vadd.f32 %v952_v3, %v951_v1 }
  0xf7   : > { %v942_v7 = vadd.f32 %v941_v4, %v940_v2  ;;  %v954_v8 = vrot.slane %v953_v5, 1 }
  0xf9   : > { %v943_v10 = vadd.f32 %v942_v7, %v933_v6  ;;  %v955_v11 = vadd.f32 %v954_v8, %v953_v5  ;;  %961 = sbr.rel (%p1083_p5) target bundleno = 288 (0x120), region = 44 }
  0xfb   : > { %944 = vst [vmem:[#allocation2] sm:$0x1] %v943_v10  ;;  %v956_v12 = vadd.f32 %v955_v11, %v945_v9 }
  0xfd   : > { %957 = vst [vmem:[#allocation3] sm:$0x1] %v956_v12 }
  0xfe   : > { %v968_v20 = vld [vmem:[%s1402_s2] sm:$0x1] }
  0xff   : > { %v973_v23 = vld [vmem:[%s1403_s3] sm:$0x1] }
 0x102   : > { %v962_v13 = vld [vmem:[#allocation2] sm:$0x1] }
 0x103   : > { %v963_v15 = vmul.f32 0.055555556, %v962_v13 }
 0x104   : > { %v964_v14 = vld [vmem:[#allocation3] sm:$0x1] }
 0x105   : > { %v965_v16 = vmul.f32 0.055555556, %v964_v14  ;;  %v966_v17 = vmul.f32 %v963_v15, %v963_v15 }
 0x107   : > { %v967_v18 = vsub.f32 %v965_v16, %v966_v17 }
 0x109   : > { %v969_v19 = vadd.f32 0.001, %v967_v18 }
 0x10b   : > { %1178 = vrsqrt.f32 %v969_v19 }
 0x118   : > { %v1179_v21 = vpop.eup %1178 }
 0x119   : > { %v971_v22 = vmul.f32 %v1179_v21, %v968_v20 }
 0x11b   : > { %972 = vst [vmem:[#allocation4] sm:$0x1] %v971_v22  ;;  %v974_v24 = vmul.f32 %v971_v22, %v963_v15 }
 0x11d   : > { %v975_v25 = vsub.f32 %v973_v23, %v974_v24 }
 0x11f   : > { %976 = vst [vmem:[#allocation6] sm:$0x1] %v975_v25 }
 0x120 PF: > { %p1163_p6 = scmp.eq.s32.totalorder %s1283_s19, 1  ;;  %s1245_s22 = smov [#allocation4]  }
 0x121   : > { %s984_s23 = sshll.u32 %s1245_s22, 4  ;;  %s1246_s24 = smov [#allocation6]   ;;  %s985_s23 = int_to_ptr.vmem [resolvable:$true] %s984_s23 }
 0x122   : > { %s995_s25 = sshll.u32 %s1246_s24, 4  ;;  %s1180_s26 = scalar_lea.vmem %s985_s23, 16  ;;  %s996_s25 = int_to_ptr.vmem [resolvable:$true] %s995_s25 }
 0x123   : > { %p1181_p7 = scmp.ne.s32.totalorder %s985_s23, %s1180_s26  ;;  %s1186_s27 = scalar_lea.vmem %s985_s23, 32 }
 0x124   : > { %p1187_p10 = scmp.lt.s32.totalorder %s985_s23, %s985_s23  ;;  %p1188_p11 = scmp.lt.s32.totalorder %s1186_s27, %s1180_s26 }
 0x125   : > { %p1182_p8 = pnand %p1181_p7, %p1163_p6 }
 0x126   : > { %p1189_p12 = por %p1188_p11, %p1187_p10 }
 0x127   : > { %p1183_p9 = pneg %p1182_p8 }
 0x129   : > { %p1190_p13 = pnand %p1189_p12, %p1183_p9 }
 0x12b   : > { %1193 = shalt.err (!%p1190_p13)
}
 0x12c   : > { %1156 = dma.vmem_to_hbm [thread:$0]  (%p1163_p6), %s985_s23, 16, %s1404_s4, [#allocation5]  }
 0x12d   : > { %s1204_s30 = scalar_lea.vmem %s996_s25, 16  ;;  %s1210_s6 = scalar_lea.vmem %s996_s25, 32 }
 0x12e   : > { %p1205_p0 = scmp.ne.s32.totalorder %s996_s25, %s1204_s30  ;;  %p1211_p3 = scmp.lt.s32.totalorder %s996_s25, %s996_s25 }
 0x12f   : > { %p1212_p4 = scmp.lt.s32.totalorder %s1210_s6, %s1204_s30 }
 0x130   : > { %p1206_p1 = pnand %p1205_p0, %p1163_p6 }
 0x131   : > { %p1213_p5 = por %p1212_p4, %p1211_p3 }
 0x132   : > { %p1207_p2 = pneg %p1206_p1 }
 0x134   : > { %p1214_p7 = pnand %p1213_p5, %p1207_p2 }
 0x136   : > { %1217 = shalt.err (!%p1214_p7)
}
 0x137   : > { %1158 = dma.vmem_to_hbm [thread:$0]  (%p1163_p6), %s996_s25, 16, %s1405_s5, [#allocation7]  }
 0x138   : > { %1233 = dma.done.wait (%p1163_p6), [#allocation5], 16  }
 0x139   : > { %1235 = vsyncadd (%p1163_p6), [#allocation5], 4294967280 }
 0x13a   : > { %1237 = dma.done.wait (%p1163_p6), [#allocation7], 16  }
 0x13b   : > { %1239 = vsyncadd (%p1163_p6), [#allocation7], 4294967280 }
 0x13c PF: > { %s18_s18 = sadd.s32 1, %s1242_s18  }
 0x13d   : > { %p15_p8 = scmp.ge.s32.totalorder %s18_s18, 4  }
 0x13f   :  { %17 = sbr.rel (!%p15_p8) target bundleno = 2 (0x2), region = 86 }
 0x144   :  { %1012 = vsyncpa [#allocation5], 1 }
 0x145   :  { %1014 = vsyncpa [#allocation5 + $0x1], 1 }
 0x146   :  { %1015 = vsyncpa [#allocation7], 1 }

</bundles_post_ra>
